<compile_context>
chip_gen: v7x
topology: tpu7x:2x2x1
jax: 0.10.0
libtpu: 0.0.40
codegen_flags: <defaults>
</compile_context>

<pallas_src>
import functools
import numpy as np
import jax
import jax.numpy as jnp
from jax import lax
from jax.experimental import pallas as pl
from jax.experimental.pallas import tpu as pltpu


def _round_up(x, m):
    return ((x + m - 1) // m) * m


def hidden_layer_kernel(x_ref, w_ref, b_ref, o_ref, acc_ref, *, use_bf16_inputs):
    # x_ref: (tm, tk), w_ref: (tn, tk)  [PyTorch (M2, M1) layout],
    # b_ref: (1, tn), o_ref: (tm, tn), acc_ref: (tm, tn) f32 scratch.
    k = pl.program_id(2)

    @pl.when(k == 0)
    def _init():
        acc_ref[...] = jnp.zeros_like(acc_ref)

    x = x_ref[...]
    w = w_ref[...]
    if use_bf16_inputs:
        x = x.astype(jnp.bfloat16)
        w = w.astype(jnp.bfloat16)

    # X @ W^T without materializing the transpose: contract dim 1 of X with
    # dim 1 of W (both are the M1/K axis).
    acc_ref[...] += lax.dot_general(
        x, w,
        dimension_numbers=(((1,), (1,)), ((), ())),
        preferred_element_type=jnp.float32,
    )

    @pl.when(k == pl.num_programs(2) - 1)
    def _finalize():
        o_ref[...] = jnp.tanh(
            acc_ref[...] + b_ref[...].astype(jnp.float32)
        ).astype(o_ref.dtype)


def hidden_layer(x, weight, bias=None, *, tm=None, tn=None, tk=None,
                 use_bf16_inputs=False):
    """Forward pass of HiddenLayer.

    x:      (B, M1) float32
    weight: (M2, M1) float32  (PyTorch nn.Linear convention, NOT transposed)
    bias:   (M2,) float32 or None
    returns (B, M2) float32 = tanh(x @ weight.T + bias)
    """
    B, M1 = x.shape
    M2, M1w = weight.shape
    assert M1 == M1w, (M1, M1w)

    if bias is None:
        bias = jnp.zeros((M2,), dtype=x.dtype)

    # Tile sizes: lane-dense (tn, tk multiples of 128), tm multiple of 8.
    # Defaults (256, 256, 512) keep the double-buffered working set ~3 MiB,
    # safe even for v7x's 64 MiB VMEM.
    if tm is None:
        tm = min(256, _round_up(B, 8))
    if tn is None:
        tn = min(256, _round_up(M2, 128))
    if tk is None:
        tk = min(512, _round_up(M1, 128))

    # Pad to tile multiples (no-op for aligned shapes; zero pads are
    # mathematically inert for the matmul, extra rows/cols sliced off below).
    Bp = _round_up(B, tm)
    M1p = _round_up(M1, tk)
    M2p = _round_up(M2, tn)

    xp = x
    if (Bp, M1p) != (B, M1):
        xp = jnp.pad(x, ((0, Bp - B), (0, M1p - M1)))
    wp = weight
    if (M2p, M1p) != (M2, M1):
        wp = jnp.pad(weight, ((0, M2p - M2), (0, M1p - M1)))
    bp = bias.reshape(1, M2)
    if M2p != M2:
        bp = jnp.pad(bp, ((0, 0), (0, M2p - M2)))

    grid = (Bp // tm, M2p // tn, M1p // tk)

    kernel = functools.partial(hidden_layer_kernel,
                               use_bf16_inputs=use_bf16_inputs)

    out = pl.pallas_call(
        kernel,
        out_shape=jax.ShapeDtypeStruct((Bp, M2p), x.dtype),
        grid_spec=pltpu.PrefetchScalarGridSpec(
            num_scalar_prefetch=0,
            grid=grid,
            in_specs=[
                pl.BlockSpec((tm, tk), lambda i, j, k: (i, k)),   # X tile
                pl.BlockSpec((tn, tk), lambda i, j, k: (j, k)),   # W tile (M2,M1)
                pl.BlockSpec((1, tn), lambda i, j, k: (0, j)),    # bias tile
            ],
            out_specs=pl.BlockSpec((tm, tn), lambda i, j, k: (i, j)),
            scratch_shapes=[pltpu.VMEM((tm, tn), jnp.float32)],
        ),
        compiler_params=pltpu.CompilerParams(
            dimension_semantics=("parallel", "parallel", "arbitrary")),
    )(xp, wp, bp)

    if (Bp, M2p) != (B, M2):
        out = out[:B, :M2]
    return out


def init_hidden_layer_params(key, M1, M2, use_bias=True, zeros=False):
    """Deterministic parameter init mirroring HiddenLayer.__init__.

    weight ~ N(0, sqrt(2/M1)) of shape (M2, M1) (or zeros);
    bias follows PyTorch Linear's uniform(-1/sqrt(M1), 1/sqrt(M1)).
    """
    kw, kb = jax.random.split(key)
    if zeros:
        weight = jnp.zeros((M2, M1), dtype=jnp.float32)
    else:
        weight = jax.random.normal(kw, (M2, M1), dtype=jnp.float32) * np.sqrt(2.0 / M1)
    bias = None
    if use_bias:
        bound = 1.0 / np.sqrt(M1)
        bias = jax.random.uniform(
            kb, (M2,), dtype=jnp.float32, minval=-bound, maxval=bound
        )
    return weight, bias


if __name__ == "__main__":
    key = jax.random.PRNGKey(0)
    kx, kp, kx2, kp2 = jax.random.split(key, 4)

    # --- Test 1: small DQN-cartpole-like shapes (single tile, padded) ---
    B, M1, M2 = 8, 16, 32
    x = jax.random.normal(kx, (B, M1), dtype=jnp.float32)
    weight, bias = init_hidden_layer_params(kp, M1, M2, use_bias=True, zeros=False)

    y = hidden_layer(x, weight, bias)
    y = jax.block_until_ready(y)
    y_ref = jnp.tanh(x @ weight.T + bias)
    np.testing.assert_allclose(np.asarray(y), np.asarray(y_ref),
                               rtol=1e-5, atol=1e-5)

    # --- Test 2: force a multi-tile (2,2,2) grid to exercise the K-axis
    # accumulator + pl.when init/finalize path, and the no-bias path ---
    B2, M1b, M2b = 16, 256, 256
    x2 = jax.random.normal(kx2, (B2, M1b), dtype=jnp.float32)
    weight2, _ = init_hidden_layer_params(kp2, M1b, M2b, use_bias=False, zeros=False)

    y2 = hidden_layer(x2, weight2, None, tm=8, tn=128, tk=128)
    y2 = jax.block_until_ready(y2)
    y2_ref = jnp.tanh(x2 @ weight2.T)
    np.testing.assert_allclose(np.asarray(y2), np.asarray(y2_ref),
                               rtol=1e-5, atol=1e-5)

    print("KERNEL_OK")
</pallas_src>

<mosaic_0001>
module attributes {stable_mosaic.version = 11 : i64} {
  func.func @hidden_layer_kernel(%arg0: i32, %arg1: i32, %arg2: i32, %arg3: memref<8x128xf32, #tpu.memory_space<vmem>>, %arg4: memref<128x128xf32, #tpu.memory_space<vmem>>, %arg5: memref<1x128xf32, #tpu.memory_space<vmem>>, %arg6: memref<8x128xf32, #tpu.memory_space<vmem>>, %arg7: memref<8x128xf32, #tpu.memory_space<vmem>>) attributes {dimension_semantics = [#tpu.dimension_semantics<parallel>, #tpu.dimension_semantics<parallel>, #tpu.dimension_semantics<arbitrary>], iteration_bounds = array<i64: 1, 1, 1>, scalar_prefetch = 0 : i64, scratch_operands = 1 : i64, tpu.core_type = #tpu.core_type<tc>, window_params = [{transform_indices = @transform_0, window_bounds = array<i64: 8, 128>}, {transform_indices = @transform_1, window_bounds = array<i64: 128, 128>}, {transform_indices = @transform_2, window_bounds = array<i64: 1, 128>}, {transform_indices = @transform_3, window_bounds = array<i64: 8, 128>}]} {
    %c0_i32 = arith.constant 0 : i32
    %0 = arith.cmpi eq, %arg2, %c0_i32 : i32
    %1 = arith.extui %0 : i1 to i32
    %c0_i32_0 = arith.constant 0 : i32
    %2 = arith.cmpi ne, %1, %c0_i32_0 : i32
    scf.if %2 {
      %cst_10 = arith.constant 0.000000e+00 : f32
      %12 = vector.broadcast %cst_10 : f32 to vector<8x128xf32>
      %c0_11 = arith.constant 0 : index
      %c0_12 = arith.constant 0 : index
      %13 = vector.load %arg7[%c0_11, %c0_12] : memref<8x128xf32, #tpu.memory_space<vmem>>, vector<8x128xf32>
      tpu.vector_store %arg7[%c0_11, %c0_12], %12 {strides = array<i32>} : memref<8x128xf32, #tpu.memory_space<vmem>>, vector<8x128xf32>,
    } else {
    }
    %c0 = arith.constant 0 : index
    %c0_1 = arith.constant 0 : index
    %3 = vector.load %arg3[%c0, %c0_1] : memref<8x128xf32, #tpu.memory_space<vmem>>, vector<8x128xf32>
    %c0_2 = arith.constant 0 : index
    %c0_3 = arith.constant 0 : index
    %4 = vector.load %arg4[%c0_2, %c0_3] : memref<128x128xf32, #tpu.memory_space<vmem>>, vector<128x128xf32>
    %c0_4 = arith.constant 0 : index
    %c0_5 = arith.constant 0 : index
    %5 = vector.load %arg7[%c0_4, %c0_5] : memref<8x128xf32, #tpu.memory_space<vmem>>, vector<8x128xf32>
    %cst = arith.constant dense<0.000000e+00> : vector<8x128xf32>
    %6 = tpu.matmul %3, %4, %cst {dimension_numbers = #tpu.dot_dimension_numbers<[1], [1], [0], [0], [0, 0, 1, 0], [], []>} : vector<8x128xf32>, vector<128x128xf32>, vector<8x128xf32> -> vector<8x128xf32>
    %7 = arith.addf %5, %6 : vector<8x128xf32>
    %c0_6 = arith.constant 0 : index
    %c0_7 = arith.constant 0 : index
    %8 = vector.load %arg7[%c0_6, %c0_7] : memref<8x128xf32, #tpu.memory_space<vmem>>, vector<8x128xf32>
    tpu.vector_store %arg7[%c0_6, %c0_7], %7 {strides = array<i32>} : memref<8x128xf32, #tpu.memory_space<vmem>>, vector<8x128xf32>,
    %c0_i32_8 = arith.constant 0 : i32
    %9 = arith.cmpi eq, %arg2, %c0_i32_8 : i32
    %10 = arith.extui %9 : i1 to i32
    %c0_i32_9 = arith.constant 0 : i32
    %11 = arith.cmpi ne, %10, %c0_i32_9 : i32
    scf.if %11 {
      %c0_10 = arith.constant 0 : index
      %c0_11 = arith.constant 0 : index
      %12 = vector.load %arg7[%c0_10, %c0_11] : memref<8x128xf32, #tpu.memory_space<vmem>>, vector<8x128xf32>
      %c0_12 = arith.constant 0 : index
      %c0_13 = arith.constant 0 : index
      %13 = vector.load %arg5[%c0_12, %c0_13] : memref<1x128xf32, #tpu.memory_space<vmem>>, vector<1x128xf32>
      %14 = vector.broadcast %13 : vector<1x128xf32> to vector<8x128xf32>
      %15 = arith.addf %12, %14 : vector<8x128xf32>
      %16 = math.tanh %15 : vector<8x128xf32>
      %c0_14 = arith.constant 0 : index
      %c0_15 = arith.constant 0 : index
      %17 = vector.load %arg6[%c0_14, %c0_15] : memref<8x128xf32, #tpu.memory_space<vmem>>, vector<8x128xf32>
      tpu.vector_store %arg6[%c0_14, %c0_15], %16 {strides = array<i32>} : memref<8x128xf32, #tpu.memory_space<vmem>>, vector<8x128xf32>,
    } else {
    }
    return
  }
  func.func @transform_0(%arg0: i32, %arg1: i32, %arg2: i32) -> (i32, i32) {
    %c0_i32 = arith.constant 0 : i32
    return %arg0, %arg2 : i32, i32
  }
  func.func @transform_1(%arg0: i32, %arg1: i32, %arg2: i32) -> (i32, i32) {
    %c0_i32 = arith.constant 0 : i32
    return %arg1, %arg2 : i32, i32
  }
  func.func @transform_2(%arg0: i32, %arg1: i32, %arg2: i32) -> (i32, i32) {
    %c0_i32 = arith.constant 0 : i32
    %c0_i32_0 = arith.constant 0 : i32
    return %c0_i32, %arg1 : i32, i32
  }
  func.func @transform_3(%arg0: i32, %arg1: i32, %arg2: i32) -> (i32, i32) {
    %c0_i32 = arith.constant 0 : i32
    return %arg0, %arg1 : i32, i32
  }
}

</mosaic_0001>

<bundles_post_ra>
// kernel: tpu_custom_call.1
= control target key start
LH: loop header
LB: loop body
LE: loop exit
PB: predicated region body
PF: predicated region fallthrough
CT: control target
= control target key end

     0   :  { %8 = vsyncpa [#allocation4], 0  ;;  %s399_s0 = inlined_call_operand.hbm [shape: f32[8,128], index: 0, kind: input, shape index: {}]   ;;  %s400_s1 = inlined_call_operand.hbm [shape: f32[128,128], index: 1, kind: input, shape index: {}]   ;;  %s401_s2 = inlined_call_operand.vmem [shape: f32[1,128], index: 2, kind: input, shape index: {}]   ;;  %s402_s3 = inlined_call_operand.hbm [shape: f32[8,128], index: 3, kind: output, shape index: {}]  }
   0x1   :  { %9 = vsyncpa [#allocation7], 0 }
   0x2   :  { %10 = vsyncpa [#allocation5], 0  ;;  %s325_s12 = smov [#allocation3]   ;;  %s326_s14 = smov [#allocation6]  }
   0x3   :  { %s17_s13 = sshll.u32 %s325_s12, 4  ;;  %s26_s15 = sshll.u32 %s326_s14, 4  ;;  %s18_s13 = int_to_ptr.vmem [resolvable:$true] %s17_s13  ;;  %s353_s15 = int_to_ptr.vmem [resolvable:$true] %s26_s15 }
   0x4   :  { %s253_s18 = scalar_lea.hbm %s399_s0, 128 }
   0x5   :  { %p254_p0 = scmp.ne.s32.totalorder %s399_s0, %s253_s18  ;;  %p257_p1 = scmp.lt.u32.totalorder %s253_s18, %s399_s0 }
   0x7   :  { %p259_p2 = pnand %p257_p1, %p254_p0 }
   0x9   :  { %262 = shalt.err (!%p259_p2)
}
   0xa   :  { %s263_s23 = scalar_lea.vmem %s18_s13, 128  ;;  %p268_p4 = scmp.lt.s32.totalorder %s18_s13, %s18_s13 }
   0xb   :  { %p264_p3 = scmp.ne.s32.totalorder %s18_s13, %s263_s23  ;;  %p269_p5 = scmp.lt.s32.totalorder %s263_s23, %s263_s23 }
   0xd   :  { %p270_p6 = por %p269_p5, %p268_p4 }
   0xf   :  { %p271_p7 = pnand %p270_p6, %p264_p3 }
  0x11   :  { %274 = shalt.err (!%p271_p7)
}
  0x12   :  { %20 = dma.hbm_to_vmem [thread:$0]  %s399_s0, 128, %s18_s13, [#allocation4]  }
  0x13   :  { %s275_s28 = scalar_lea.hbm %s400_s1, 2048 }
  0x14   :  { %p276_p8 = scmp.ne.s32.totalorder %s400_s1, %s275_s28  ;;  %p279_p9 = scmp.lt.u32.totalorder %s275_s28, %s400_s1 }
  0x16   :  { %p281_p10 = pnand %p279_p9, %p276_p8 }
  0x18   :  { %284 = shalt.err (!%p281_p10)
}
  0x19   :  { %s285_s6 = scalar_lea.vmem %s353_s15, 2048  ;;  %p290_p12 = scmp.lt.s32.totalorder %s353_s15, %s353_s15 }
  0x1a   :  { %p286_p11 = scmp.ne.s32.totalorder %s353_s15, %s285_s6  ;;  %p291_p13 = scmp.lt.s32.totalorder %s285_s6, %s285_s6 }
  0x1c   :  { %p292_p0 = por %p291_p13, %p290_p12 }
  0x1e   :  { %p293_p1 = pnand %p292_p0, %p286_p11 }
  0x20   :  { %296 = shalt.err (!%p293_p1)
}
  0x21   :  { %s327_s0 = smov 128   ;;  %s328_s7 = smov 8  }
  0x22   :  { %32 = dma.hbm_to_vmem [thread:$0]  %s400_s1, 2048, %s353_s15, [#allocation7], %s327_s0, %s327_s0, %s328_s7  }
  0x23   :  { %319 = dma.done.wait [#allocation4], 128  }
  0x24   :  { %320 = vsyncadd [#allocation4], 4294967168 }
  0x25   :  { %321 = dma.done.wait [#allocation7], 2048  }
  0x26   :  { %322 = vsyncadd [#allocation7], 4294965248  ;;  %v329_v0 = vmov 0.0|0.0   ;;  %vm330_vm0 = vmmov 0   ;;  %v331_v1 = vmov 0.0   ;;  %v47_v2 = vld [vmem:[#allocation6] sm:$0xff] }
  0x27   :  { %219 = vmatprep.subr.bf16.mxu0 %v329_v0  ;;  %216 = vmatprep.mubr.msk.f32.mxu0 %vm330_vm0, %v331_v1  ;;  %v48_v3 = vld [vmem:[#allocation6 + $0x8] sm:$0xff]  ;;  %v49_v5 = vld [vmem:[#allocation6 + $0x10] sm:$0xff]  ;;  %v50_v6 = vld [vmem:[#allocation6 + $0x18] sm:$0xff]  ;;  %s332_s11 = smov [#allocation8]  }
  0x28   :  { %v220_v4 = vpack.c.bf16 %v48_v3, %v47_v2  ;;  %v223_v7 = vpack.c.bf16 %v50_v6, %v49_v5  ;;  %v51_v8 = vld [vmem:[#allocation6 + $0x20] sm:$0xff]  ;;  %v52_v9 = vld [vmem:[#allocation6 + $0x28] sm:$0xff]  ;;  %v53_v11 = vld [vmem:[#allocation6 + $0x30] sm:$0xff]  ;;  %s156_s12 = sshll.u32 %s332_s11, 4  ;;  %s157_s12 = int_to_ptr.vmem [resolvable:$true] %s156_s12 }
  0x29   :  { %v226_v10 = vpack.c.bf16 %v52_v9, %v51_v8  ;;  %v54_v12 = vld [vmem:[#allocation6 + $0x38] sm:$0xff]  ;;  %v55_v14 = vld [vmem:[#allocation6 + $0x40] sm:$0xff]  ;;  %v56_v15 = vld [vmem:[#allocation6 + $0x48] sm:$0xff]  ;;  %s297_s13 = scalar_lea.vmem %s157_s12, 128  ;;  %p302_p3 = scmp.lt.s32.totalorder %s157_s12, %s157_s12 }
  0x2a   :  { %221 = vmatpush3.bf16.xpose.msra.mxu0 %v220_v4  ;;  %v229_v13 = vpack.c.bf16 %v54_v12, %v53_v11  ;;  %v232_v16 = vpack.c.bf16 %v56_v15, %v55_v14  ;;  %v57_v17 = vld [vmem:[#allocation6 + $0x50] sm:$0xff]  ;;  %v58_v18 = vld [vmem:[#allocation6 + $0x58] sm:$0xff]  ;;  %v59_v20 = vld [vmem:[#allocation6 + $0x60] sm:$0xff]  ;;  %p298_p2 = scmp.ne.s32.totalorder %s157_s12, %s297_s13  ;;  %p303_p4 = scmp.lt.s32.totalorder %s297_s13, %s297_s13 }
  0x2b   :  { %222 = vmatprep.subr.bf16.mxu0 %v329_v0  ;;  %v235_v19 = vpack.c.bf16 %v58_v18, %v57_v17  ;;  %v60_v21 = vld [vmem:[#allocation6 + $0x68] sm:$0xff]  ;;  %v61_v23 = vld [vmem:[#allocation6 + $0x70] sm:$0xff]  ;;  %v62_v24 = vld [vmem:[#allocation6 + $0x78] sm:$0xff] }
  0x2c   :  { %v238_v22 = vpack.c.bf16 %v60_v21, %v59_v20  ;;  %v241_v25 = vpack.c.bf16 %v62_v24, %v61_v23  ;;  %v46_v26 = vld [vmem:[#allocation3] sm:$0xff]  ;;  %p304_p5 = por %p303_p4, %p302_p3 }
  0x2d   :  { %v166_v27 = vld [vmem:[%s401_s2] ss:$0 sm:$0xff] }
  0x2e   :  { %p305_p6 = pnand %p304_p5, %p298_p2 }
  0x32   :  { %224 = vmatpush3.bf16.xpose.msra.mxu0 %v223_v7 }
  0x33   :  { %225 = vmatprep.subr.bf16.mxu0 %v329_v0 }
  0x3a   :  { %227 = vmatpush3.bf16.xpose.msra.mxu0 %v226_v10 }
  0x3b   :  { %228 = vmatprep.subr.bf16.mxu0 %v329_v0 }
  0x42   :  { %230 = vmatpush3.bf16.xpose.msra.mxu0 %v229_v13 }
  0x43   :  { %231 = vmatprep.subr.bf16.mxu0 %v329_v0 }
  0x4a   :  { %233 = vmatpush3.bf16.xpose.msra.mxu0 %v232_v16 }
  0x4b   :  { %234 = vmatprep.subr.bf16.mxu0 %v329_v0 }
  0x52   :  { %236 = vmatpush3.bf16.xpose.msra.mxu0 %v235_v19 }
  0x53   :  { %237 = vmatprep.subr.bf16.mxu0 %v329_v0 }
  0x5a   :  { %239 = vmatpush3.bf16.xpose.msra.mxu0 %v238_v22 }
  0x5b   :  { %240 = vmatprep.subr.bf16.mxu0 %v329_v0 }
  0x62   :  { %242 = vmatpush3.bf16.xpose.msra.mxu0 %v241_v25 }
  0x69   :  { %217 = vmatmul.mubr.f32.vlgmr.msra.gmra.mrb[0].mxu0 %v46_v26 }
 0x13c   :  { %v130_v28 = vpop.f32.mrb[0].mxu0 }
 0x13d   :  { %v147_v29 = vadd.f32 %v166_v27, %v130_v28  ;;  %v218_v30 = vpop.f32.mrb[1].mxu0 }
 0x13f   :  { %251 = vtanh.f32 %v147_v29 }
 0x149   :  { %v252_v31 = vpop.eup %251 }
 0x14a   :  { %149 = vst [vmem:[#allocation8] sm:$0xff] %v252_v31 }
 0x14b   :  { %308 = shalt.err (!%p305_p6)
}
 0x14c   :  { %s309_s2 = scalar_lea.hbm %s402_s3, 128 }
 0x14d   :  { %p310_p7 = scmp.ne.s32.totalorder %s402_s3, %s309_s2  ;;  %p313_p8 = scmp.lt.u32.totalorder %s309_s2, %s402_s3 }
 0x14f   :  { %p315_p9 = pnand %p313_p8, %p310_p7 }
 0x151   :  { %318 = shalt.err (!%p315_p9)
}
 0x152   :  { %159 = dma.vmem_to_hbm [thread:$0]  %s157_s12, 128, %s402_s3, [#allocation5]  }
 0x153   :  { %323 = dma.done.wait [#allocation5], 128  }
 0x154   :  { %324 = vsyncadd [#allocation5], 4294967168 }
 0x155   :  { %163 = vsyncpa [#allocation4], 1 }
 0x156   :  { %164 = vsyncpa [#allocation7], 1 }
 0x157   :  { %165 = vsyncpa [#allocation5], 1 }

</bundles_post_ra>
